<compile_context>
chip_gen: v5e
topology: v5e:2x2
jax: 0.10.0
libtpu: 0.0.40
codegen_flags: <defaults>
</compile_context>

<pallas_src>
import functools

import numpy as np
import jax
import jax.numpy as jnp
from jax import lax
from jax.experimental import pallas as pl
from jax.experimental.pallas import tpu as pltpu


def _round_up(x, m):
    return (x + m - 1) // m * m


def _hier_ce_kernel(w_ref, mask_ref, tgt_ref, x_ref, out_ref, *,
                    n_levels, batch, tile_b, inv_batch):
    """One batch tile: weighted sum over levels of softmax-CE partial sums."""
    i = pl.program_id(0)

    x = x_ref[...].astype(jnp.float32)                    # (TB, Cpad), upcast in-kernel
    tgt = tgt_ref[...]                                    # (TB, 1) int32 global class ids

    # logit at the target column (same column for every level).
    col = lax.broadcasted_iota(jnp.int32, x.shape, 1)
    picked = jnp.sum(jnp.where(col == tgt, x, 0.0), axis=-1, keepdims=True)   # (TB, 1)

    # mask rows that are batch padding.
    row = lax.broadcasted_iota(jnp.int32, (tile_b, 1), 0) + i * tile_b
    valid = (row < batch).astype(jnp.float32)             # (TB, 1)

    acc = jnp.zeros((tile_b, 1), jnp.float32)
    for level in range(n_levels):                         # small static unroll; x loaded once
        xm = x + mask_ref[pl.ds(level, 1), :]             # out-of-level cols -> ~-1e30
        m = jnp.max(xm, axis=-1, keepdims=True)
        lse = m + jnp.log(jnp.sum(jnp.exp(xm - m), axis=-1, keepdims=True))
        acc = acc + w_ref[level] * (lse - picked)

    partial = jnp.sum(acc * valid) * inv_batch
    out_ref[...] = jnp.full((1, 1, 128), partial, dtype=jnp.float32)


def hierarchical_loss_pallas(logits, targets, hierarchy, level_weights=None):
    """JAX/Pallas equivalent of HierarchicalLoss.forward (CrossEntropyLoss base)."""
    B, C_total = logits.shape
    B, C_total = int(B), int(C_total)
    L = len(hierarchy)
    if level_weights is None:
        level_weights = [1.0] * L

    c_pad = _round_up(C_total, 128)                       # lane-dense class axis

    # Additive per-level class mask, built host-side from the python hierarchy.
    mask_np = np.full((L, c_pad), -1e30, dtype=np.float32)
    for level in range(L):
        mask_np[level, np.asarray(hierarchy[level], dtype=np.int64)] = 0.0
    mask = jnp.asarray(mask_np)                           # (L, c_pad) f32

    weights = jnp.asarray(list(level_weights), dtype=jnp.float32)   # (L,)

    # Batch tile sized against a conservative per-buffer VMEM budget (~4 MiB,
    # double-buffered -> ~8 MiB): fits v5e's 16 MiB and v7x's 32 MiB scoped
    # defaults without touching vmem_limit_bytes.
    itemsize = jnp.dtype(logits.dtype).itemsize
    row_bytes = c_pad * itemsize
    max_rows = max(8, ((4 << 20) // row_bytes) // 8 * 8)
    tile_b = int(min(_round_up(B, 8), max_rows))
    n_tiles = (B + tile_b - 1) // tile_b
    b_pad = n_tiles * tile_b

    x = logits
    if b_pad != B or c_pad != C_total:
        x = jnp.pad(x, ((0, b_pad - B), (0, c_pad - C_total)))

    # NOTE: as in the PyTorch module (dict lookup mapping[t.item()]), every
    # target class must belong to every level; the picked logit is then
    # logits[b, targets[b]] at every level.
    tgt = targets.astype(jnp.int32)
    if b_pad != B:
        tgt = jnp.pad(tgt, (0, b_pad - B))
    tgt = tgt[:, None]                                    # (b_pad, 1)

    kernel = functools.partial(
        _hier_ce_kernel, n_levels=L, batch=B, tile_b=tile_b,
        inv_batch=float(1.0 / B))

    out = pl.pallas_call(
        kernel,
        out_shape=jax.ShapeDtypeStruct((n_tiles, 1, 128), jnp.float32),
        grid_spec=pltpu.PrefetchScalarGridSpec(
            num_scalar_prefetch=0,
            grid=(n_tiles,),
            in_specs=[
                pl.BlockSpec(memory_space=pltpu.MemorySpace.SMEM),    # level weights (L,)
                pl.BlockSpec((L, c_pad), lambda i: (0, 0)),           # level mask (replicated)
                pl.BlockSpec((tile_b, 1), lambda i: (i, 0)),          # targets tile
                pl.BlockSpec((tile_b, c_pad), lambda i: (i, 0)),      # logits tile (orig dtype)
            ],
            out_specs=pl.BlockSpec((1, 1, 128), lambda i: (i, 0, 0)),
        ),
        compiler_params=pltpu.CompilerParams(
            dimension_semantics=("parallel",)),
    )(weights, mask, tgt, x)

    return jnp.sum(out[:, 0, 0])


def _reference(logits, targets, hierarchy, level_weights):
    total = jnp.float32(0.0)
    for lvl, w in enumerate(level_weights):
        cls = jnp.asarray(hierarchy[lvl], dtype=jnp.int32)
        ll = jnp.take(logits, cls, axis=1).astype(jnp.float32)
        mapping = {int(c): i for i, c in enumerate(hierarchy[lvl])}
        lt = jnp.asarray([mapping[int(t)] for t in targets], dtype=jnp.int32)
        logp = jax.nn.log_softmax(ll, axis=-1)
        nll = -jnp.mean(logp[jnp.arange(ll.shape[0]), lt])
        total = total + w * nll
    return total


if __name__ == "__main__":
    key = jax.random.PRNGKey(0)
    k1, k2 = jax.random.split(key)

    B = 10           # batch (not a multiple of 8 -> exercises row masking)
    C_total = 16     # total classes in the flat logit vector
    # hierarchy: level -> global class ids at that level (each level must
    # contain every target value, matching the PyTorch _map_targets contract)
    hierarchy = {0: [0, 1, 2, 3], 1: [0, 1, 2, 3, 4, 5, 6, 7]}
    level_weights = [1.0, 0.5]

    logits = jax.random.normal(k1, (B, C_total), dtype=jnp.float32)
    targets = jax.random.randint(k2, (B,), 0, 4, dtype=jnp.int32)  # within level-0 classes

    loss = hierarchical_loss_pallas(logits, targets, hierarchy, level_weights)
    loss = jax.block_until_ready(loss)

    ref = _reference(logits, targets, hierarchy, level_weights)
    assert jnp.allclose(loss, ref, atol=1e-4, rtol=1e-4), (loss, ref)

    print("KERNEL_OK")
</pallas_src>

<mosaic_0001>
module attributes {stable_mosaic.version = 11 : i64} {
  func.func @_hier_ce_kernel(%arg0: i32, %arg1: memref<2xf32, #tpu.memory_space<smem>>, %arg2: memref<2x128xf32, #tpu.memory_space<vmem>>, %arg3: memref<16x1xi32, #tpu.memory_space<vmem>>, %arg4: memref<16x128xf32, #tpu.memory_space<vmem>>, %arg5: memref<1x1x128xf32, #tpu.memory_space<vmem>>) attributes {dimension_semantics = [#tpu.dimension_semantics<parallel>], iteration_bounds = array<i64: 1>, scalar_prefetch = 0 : i64, scratch_operands = 0 : i64, tpu.core_type = #tpu.core_type<tc>, window_params = [{transform_indices = @transform_0, window_bounds = array<i64: 2>}, {pipeline_mode = #tpu.pipeline_mode<synchronous>, transform_indices = @transform_1, window_bounds = array<i64: 2, 128>}, {transform_indices = @transform_2, window_bounds = array<i64: 16, 1>}, {transform_indices = @transform_3, window_bounds = array<i64: 16, 128>}, {transform_indices = @transform_4, window_bounds = array<i64: 1, 1, 128>}]} {
    %c0 = arith.constant 0 : index
    %c0_0 = arith.constant 0 : index
    %0 = vector.load %arg4[%c0, %c0_0] : memref<16x128xf32, #tpu.memory_space<vmem>>, vector<16x128xf32>
    %c0_1 = arith.constant 0 : index
    %c0_2 = arith.constant 0 : index
    %1 = vector.load %arg3[%c0_1, %c0_2] : memref<16x1xi32, #tpu.memory_space<vmem>>, vector<16x1xi32>
    %2 = tpu.iota {dimensions = array<i32: 1>} : vector<16x128xi32>
    %3 = vector.broadcast %1 : vector<16x1xi32> to vector<16x128xi32>
    %4 = arith.cmpi eq, %2, %3 : vector<16x128xi32>
    %cst = arith.constant 0.000000e+00 : f32
    %5 = vector.broadcast %cst : f32 to vector<16x128xf32>
    %6 = arith.select %4, %0, %5 : vector<16x128xi1>, vector<16x128xf32>
    %cst_3 = arith.constant dense<0.000000e+00> : vector<16xf32>
    %7 = vector.multi_reduction <add>, %6, %cst_3 [1] : vector<16x128xf32> to vector<16xf32>
    %8 = vector.shape_cast %7 : vector<16xf32> to vector<16x1xf32>
    %9 = tpu.iota {dimensions = array<i32: 0>} : vector<16x1xi32>
    %c16_i32 = arith.constant 16 : i32
    %10 = arith.muli %arg0, %c16_i32 : i32
    %11 = vector.broadcast %10 : i32 to vector<16x1xi32>
    %12 = arith.addi %9, %11 : vector<16x1xi32>
    %c10_i32 = arith.constant 10 : i32
    %13 = vector.broadcast %c10_i32 : i32 to vector<16x1xi32>
    %14 = arith.cmpi slt, %12, %13 : vector<16x1xi32>
    %15 = arith.extui %14 : vector<16x1xi1> to vector<16x1xi32>
    %16 = arith.sitofp %15 : vector<16x1xi32> to vector<16x1xf32>
    %cst_4 = arith.constant 0.000000e+00 : f32
    %17 = vector.broadcast %cst_4 : f32 to vector<16x1xf32>
    %c0_5 = arith.constant 0 : index
    %c0_6 = arith.constant 0 : index
    %18 = vector.load %arg2[%c0_5, %c0_6] : memref<2x128xf32, #tpu.memory_space<vmem>>, vector<1x128xf32>
    %19 = vector.broadcast %18 : vector<1x128xf32> to vector<16x128xf32>
    %20 = arith.addf %0, %19 : vector<16x128xf32>
    %cst_7 = arith.constant dense<0xFF800000> : vector<16xf32>
    %21 = vector.multi_reduction <maximumf>, %20, %cst_7 [1] : vector<16x128xf32> to vector<16xf32>
    %22 = vector.shape_cast %21 : vector<16xf32> to vector<16x1xf32>
    %23 = vector.broadcast %22 : vector<16x1xf32> to vector<16x128xf32>
    %24 = arith.subf %20, %23 : vector<16x128xf32>
    %25 = math.exp %24 : vector<16x128xf32>
    %cst_8 = arith.constant dense<0.000000e+00> : vector<16xf32>
    %26 = vector.multi_reduction <add>, %25, %cst_8 [1] : vector<16x128xf32> to vector<16xf32>
    %27 = vector.shape_cast %26 : vector<16xf32> to vector<16x1xf32>
    %28 = math.log %27 : vector<16x1xf32>
    %29 = arith.addf %22, %28 : vector<16x1xf32>
    %c0_9 = arith.constant 0 : index
    %30 = memref.load %arg1[%c0_9] : memref<2xf32, #tpu.memory_space<smem>>
    %31 = arith.subf %29, %8 : vector<16x1xf32>
    %32 = vector.broadcast %30 : f32 to vector<16x1xf32>
    %33 = arith.mulf %32, %31 : vector<16x1xf32>
    %34 = arith.addf %17, %33 : vector<16x1xf32>
    %c1 = arith.constant 1 : index
    %c0_10 = arith.constant 0 : index
    %35 = vector.load %arg2[%c1, %c0_10] : memref<2x128xf32, #tpu.memory_space<vmem>>, vector<1x128xf32>
    %36 = vector.broadcast %35 : vector<1x128xf32> to vector<16x128xf32>
    %37 = arith.addf %0, %36 : vector<16x128xf32>
    %cst_11 = arith.constant dense<0xFF800000> : vector<16xf32>
    %38 = vector.multi_reduction <maximumf>, %37, %cst_11 [1] : vector<16x128xf32> to vector<16xf32>
    %39 = vector.shape_cast %38 : vector<16xf32> to vector<16x1xf32>
    %40 = vector.broadcast %39 : vector<16x1xf32> to vector<16x128xf32>
    %41 = arith.subf %37, %40 : vector<16x128xf32>
    %42 = math.exp %41 : vector<16x128xf32>
    %cst_12 = arith.constant dense<0.000000e+00> : vector<16xf32>
    %43 = vector.multi_reduction <add>, %42, %cst_12 [1] : vector<16x128xf32> to vector<16xf32>
    %44 = vector.shape_cast %43 : vector<16xf32> to vector<16x1xf32>
    %45 = math.log %44 : vector<16x1xf32>
    %46 = arith.addf %39, %45 : vector<16x1xf32>
    %c1_13 = arith.constant 1 : index
    %47 = memref.load %arg1[%c1_13] : memref<2xf32, #tpu.memory_space<smem>>
    %48 = arith.subf %46, %8 : vector<16x1xf32>
    %49 = vector.broadcast %47 : f32 to vector<16x1xf32>
    %50 = arith.mulf %49, %48 : vector<16x1xf32>
    %51 = arith.addf %34, %50 : vector<16x1xf32>
    %52 = arith.mulf %51, %16 : vector<16x1xf32>
    %53 = vector.shape_cast %52 : vector<16x1xf32> to vector<1x16x1xf32>
    %cst_14 = arith.constant dense<0.000000e+00> : vector<1xf32>
    %54 = vector.multi_reduction <add>, %53, %cst_14 [1, 2] : vector<1x16x1xf32> to vector<1xf32>
    %55 = vector.shape_cast %54 : vector<1xf32> to vector<1x1x1xf32>
    %56 = vector.extract %55[0, 0, 0] : f32 from vector<1x1x1xf32>
    %cst_15 = arith.constant 1.000000e-01 : f32
    %57 = arith.mulf %56, %cst_15 : f32
    %58 = vector.broadcast %57 : f32 to vector<1x1x128xf32>
    %c0_16 = arith.constant 0 : index
    %c0_17 = arith.constant 0 : index
    %c0_18 = arith.constant 0 : index
    %59 = vector.load %arg5[%c0_16, %c0_17, %c0_18] : memref<1x1x128xf32, #tpu.memory_space<vmem>>, vector<1x1x128xf32>
    tpu.vector_store %arg5[%c0_16, %c0_17, %c0_18], %58 {strides = array<i32>} : memref<1x1x128xf32, #tpu.memory_space<vmem>>, vector<1x1x128xf32>,
    return
  }
  func.func @transform_0(%arg0: i32) -> i32 {
    %c0_i32 = arith.constant 0 : i32
    %c0_i32_0 = arith.constant 0 : i32
    return %c0_i32 : i32
  }
  func.func @transform_1(%arg0: i32) -> (i32, i32) {
    %c0_i32 = arith.constant 0 : i32
    %c0_i32_0 = arith.constant 0 : i32
    %c0_i32_1 = arith.constant 0 : i32
    return %c0_i32, %c0_i32_0 : i32, i32
  }
  func.func @transform_2(%arg0: i32) -> (i32, i32) {
    %c0_i32 = arith.constant 0 : i32
    %c0_i32_0 = arith.constant 0 : i32
    return %arg0, %c0_i32 : i32, i32
  }
  func.func @transform_3(%arg0: i32) -> (i32, i32) {
    %c0_i32 = arith.constant 0 : i32
    %c0_i32_0 = arith.constant 0 : i32
    return %arg0, %c0_i32 : i32, i32
  }
  func.func @transform_4(%arg0: i32) -> (i32, i32, i32) {
    %c0_i32 = arith.constant 0 : i32
    %c0_i32_0 = arith.constant 0 : i32
    %c0_i32_1 = arith.constant 0 : i32
    return %arg0, %c0_i32, %c0_i32_0 : i32, i32, i32
  }
}

</mosaic_0001>

<bundles_post_ra>
// kernel: tpu_custom_call.1
= control target key start
LH: loop header
LB: loop body
LE: loop exit
PB: predicated region body
PF: predicated region fallthrough
CT: control target
= control target key end

     0   :  { %9 = vsyncpa [#allocation5], 0  ;;  %s324_s0 = inlined_call_operand.vmem [shape: f32[2], index: 0, kind: input, shape index: {}]   ;;  %s325_s1 = inlined_call_operand.hbm [shape: f32[2,128], index: 1, kind: input, shape index: {}]   ;;  %s326_s2 = inlined_call_operand.vmem [shape: s32[16,1], index: 2, kind: input, shape index: {}]   ;;  %s327_s3 = inlined_call_operand.vmem [shape: f32[16,128], index: 3, kind: input, shape index: {}]   ;;  %s328_s4 = inlined_call_operand.hbm [shape: f32[1,1,128], index: 4, kind: output, shape index: {}]  }
   0x1   :  { %10 = vsyncpa [#allocation3], 0 }
   0x2   :  { %11 = vsyncpa [#allocation4], 0  ;;  %s17_s17 = sshll.u32 %s324_s0, 4  ;;  %s26_s20 = sshll.u32 %s325_s1, 4  ;;  %s18_s17 = int_to_ptr.vmem [resolvable:$true] %s17_s17  ;;  %s27_s20 = int_to_ptr.hbm [resolvable:$true] %s26_s20 }
   0x3   :  { %s273_s21 = smov [#allocation2]   ;;  %s274_s22 = smov [#allocation6]  }
   0x4   :  { %20 = dma.vmem_to_smem %s18_s17, 16, %s273_s21, [#allocation5]  }
   0x5   :  { %s28_s23 = sshll.u32 %s274_s22, 4  ;;  %s29_s23 = int_to_ptr.vmem [resolvable:$true] %s28_s23 }
   0x6   :  { %31 = dma.hbm_to_vmem [thread:$0]  %s27_s20, 32, %s29_s23, [#allocation3]  }
   0x7   :  { %267 = dma.done.wait [#allocation5], 16  }
   0x8   :  { %268 = vsyncadd [#allocation5], 4294967280 }
   0x9   :  { %269 = dma.done.wait [#allocation3], 32  }
   0xa   :  { %270 = vsyncadd [#allocation3], 4294967264 }
   0xb   :  { %44 = sfence }
   0xc   :  { %v46_v0 = vld [vmem:[%s327_s3 + $0x8] sm:$0xff]  ;;  %v189_v1 = vld [vmem:[#allocation6] ss:$0 sm:$0xff]  ;;  %v275_v3 = vmov 0   ;;  %v190_v7 = vld [vmem:[#allocation6 + $0x1] ss:$0 sm:$0xff]  ;;  %v49_v26 = vlaneseq }
   0xd   :  { %v45_v2 = vld [vmem:[%s327_s3] sm:$0xff]  ;;  %187 = vset.pattern.permute.xlu2 %v275_v3  ;;  %188 = vset.pattern.permute.xlu0 %v275_v3  ;;  %v81_v4 = vadd.f32 %v189_v1, %v46_v0  ;;  %v48_v6 = vld [vmem:[%s326_s2 + $0x8] sm:$0xff]  ;;  %v113_v8 = vadd.f32 %v190_v7, %v46_v0  ;;  %s179_s3 = sld [smem:[#allocation2 + $0x1]]  ;;  %v276_v63 = vmov 0.0   ;;  %vm144_vm3 = vcmask 7168   ;;  %s277_s30 = smov [#allocation7]  }
   0xe   :  { %v80_v5 = vadd.f32 %v189_v1, %v45_v2  ;;  %55 = vperm.xlu2 %187, %v48_v6   ;;  %v112_v9 = vadd.f32 %v190_v7, %v45_v2  ;;  %v47_v10 = vld [vmem:[%s326_s2] sm:$0xff]  ;;  %v50_v29 = vand.u32 127, %v49_v26  ;;  %s102_s2 = sld [smem:[#allocation2]]  ;;  %v66_v39 = vshrl.u32 %v49_v26, 7  ;;  %s165_s5 = sshll.u32 %s277_s30, 4  ;;  %s166_s5 = int_to_ptr.vmem [resolvable:$true] %s165_s5 }
   0xf   :  { %84 = vmax.xlane.f32.xlu0 %v81_v4  ;;  %s167_s8 = sshll.u32 %s328_s4, 4  ;;  %s168_s8 = int_to_ptr.hbm [resolvable:$true] %s167_s8 }
  0x10   :  { %82 = vmax.xlane.f32.xlu1 %v80_v5  ;;  %v67_v47 = vadd.s32 8, %v66_v39 }
  0x12   :  { %vm73_vm2 = vcmp.lt.s32.totalorder %v67_v47, 10 }
  0x13   :  { %v137_v55 = vstv %s179_s3 }
  0x14   :  { %v105_v53 = vstv %s102_s2 }
  0x16   :  { %52 = vperm.xlu2 %187, %v47_v10  }
  0x17   :  { %116 = vmax.xlane.f32.xlu0 %v113_v8 }
  0x18   :  { %114 = vmax.xlane.f32.xlu1 %v112_v9 }
  0x68   :  { %v56_v25 = vpop.permute.xlu2 %55 }
  0x69   :  { %vm58_vm0 = vcmp.eq.s32.totalorder %v50_v29, %v56_v25 }
  0x6a   :  { %v60_v31 = vsel %vm58_vm0, %v46_v0, 0.0  ;;  %v178_v0 = vsel %vm73_vm2, 1.0, %v276_v63 }
  0x70   :  { %v53_v30 = vpop.permute.xlu2 %52 }
  0x71   :  { %vm57_vm1 = vcmp.eq.s32.totalorder %v50_v29, %v53_v30 }
  0x72   :  { %v59_v32 = vsel %vm57_vm1, %v45_v2, 0.0 }
  0x82   :  { %v85_v11 = vpop.xlane.xlu0 %84 }
  0x83   :  { %v83_v12 = vpop.xlane.xlu1 %82  ;;  %v87_v13 = vsub.f32 %v81_v4, %v85_v11 }
  0x84   :  { %v86_v14 = vsub.f32 %v80_v5, %v83_v12 }
  0x85   :  { %v90_v15 = vmul.f32 1.442695, %v87_v13 }
  0x86   :  { %v88_v16 = vmul.f32 1.442695, %v86_v14 }
  0x87   :  { %191 = vpow2.f32 %v90_v15 }
  0x88   :  { %193 = vpow2.f32 %v88_v16 }
  0x8a   :  { %v117_v17 = vpop.xlane.xlu0 %116 }
  0x8b   :  { %v115_v18 = vpop.xlane.xlu1 %114  ;;  %v119_v19 = vsub.f32 %v113_v8, %v117_v17 }
  0x8c   :  { %v118_v20 = vsub.f32 %v112_v9, %v115_v18 }
  0x8d   :  { %v192_v21 = vpop.eup %191  ;;  %v122_v22 = vmul.f32 1.442695, %v119_v19 }
  0x8e   :  { %v120_v23 = vmul.f32 1.442695, %v118_v20  ;;  %v194_v24 = vpop.eup %193  ;;  %94 = vadd.xlane.f32.xlu0 %v192_v21 }
  0x8f   :  { %195 = vpow2.f32 %v122_v22  ;;  %92 = vadd.xlane.f32.xlu2 %v194_v24 }
  0x90   :  { %197 = vpow2.f32 %v120_v23 }
  0x95   :  { %v196_v27 = vpop.eup %195 }
  0x96   :  { %v198_v28 = vpop.eup %197  ;;  %126 = vadd.xlane.f32.xlu1 %v196_v27 }
  0x97   :  { %124 = vadd.xlane.f32.xlu0 %v198_v28 }
  0x9e   :  { %63 = vadd.xlane.f32.xlu1 %v60_v31 }
  0x9f   :  { %61 = vadd.xlane.f32.xlu0 %v59_v32 }
 0x101   :  { %v95_v33 = vpop.xlane.xlu0 %94 }
 0x102   :  { %v93_v34 = vpop.xlane.xlu2 %92  ;;  %199 = vlog2.f32 %v95_v33 }
 0x103   :  { %201 = vlog2.f32 %v93_v34 }
 0x108   :  { %v200_v36 = vpop.eup %199 }
 0x109   :  { %v127_v35 = vpop.xlane.xlu1 %126  ;;  %v202_v38 = vpop.eup %201  ;;  %v99_v40 = vmul.f32 0.6931472, %v200_v36 }
 0x10a   :  { %v125_v37 = vpop.xlane.xlu0 %124  ;;  %203 = vlog2.f32 %v127_v35  ;;  %v97_v41 = vmul.f32 0.6931472, %v202_v38 }
 0x10b   :  { %205 = vlog2.f32 %v125_v37  ;;  %v101_v45 = vadd.f32 %v99_v40, %v85_v11 }
 0x10c   :  { %v100_v49 = vadd.f32 %v97_v41, %v83_v12 }
 0x110   :  { %v204_v42 = vpop.eup %203 }
 0x111   :  { %v206_v43 = vpop.eup %205  ;;  %v131_v44 = vmul.f32 0.6931472, %v204_v42  ;;  %v64_v46 = vpop.xlane.xlu1 %63 }
 0x112   :  { %v129_v48 = vmul.f32 0.6931472, %v206_v43  ;;  %v62_v50 = vpop.xlane.xlu0 %61  ;;  %v104_v52 = vsub.f32 %v101_v45, %v64_v46 }
 0x113   :  { %v133_v51 = vadd.f32 %v131_v44, %v117_v17  ;;  %v103_v56 = vsub.f32 %v100_v49, %v62_v50 }
 0x114   :  { %v132_v54 = vadd.f32 %v129_v48, %v115_v18  ;;  %v107_v59 = vmul.f32 %v105_v53, %v104_v52 }
 0x115   :  { %v136_v57 = vsub.f32 %v133_v51, %v64_v46  ;;  %v106_v61 = vmul.f32 %v105_v53, %v103_v56 }
 0x116   :  { %v135_v58 = vsub.f32 %v132_v54, %v62_v50 }
 0x117   :  { %v139_v60 = vmul.f32 %v137_v55, %v136_v57 }
 0x118   :  { %v138_v62 = vmul.f32 %v137_v55, %v135_v58 }
 0x119   :  { %v141_v1 = vadd.f32 %v139_v60, %v107_v59 }
 0x11a   :  { %v140_v2 = vadd.f32 %v138_v62, %v106_v61 }
 0x11b   :  { %v143_v3 = vmul.f32 %v178_v0, %v141_v1 }
 0x11c   :  { %v145_v4 = vsel %vm144_vm3, %v140_v2, 0.0 }
 0x11d   :  { %v146_v5 = vsel %vm144_vm3, %v143_v3, 0.0 }
 0x11e   :  { %v147_v6 = vadd.f32 %v146_v5, %v145_v4 }
 0x120   :  { %148 = vadd.xlane.f32.xlu1 %v147_v6 }
 0x193   :  { %v149_v7 = vpop.xlane.xlu1 %148 }
 0x194   :  { %v150_v8 = vrot.slane %v149_v7, 4 }
 0x196   :  { %v151_v9 = vadd.f32 %v150_v8, %v149_v7 }
 0x198   :  { %v152_v10 = vrot.slane %v151_v9, 2 }
 0x19a   :  { %v153_v11 = vadd.f32 %v152_v10, %v151_v9 }
 0x19c   :  { %v154_v12 = vrot.slane %v153_v11, 1 }
 0x19e   :  { %v155_v13 = vadd.f32 %v154_v12, %v153_v11 }
 0x1a0   :  { %180 = vpush %v155_v13 }
 0x1d1   :  { %s181_s9 = spop %180 }
 0x1d2   :  { %s157_s10 = smul.f32 0.1, %s181_s9 }
 0x1d4   :  { %v158_v14 = vstv %s157_s10 }
 0x1d5   :  { %159 = vst [vmem:[#allocation7] sm:$0x1] %v158_v14 }
 0x1d6   :  { %170 = dma.vmem_to_hbm [thread:$0]  %s166_s5, 16, %s168_s8, [#allocation4]  }
 0x1d7   :  { %271 = dma.done.wait [#allocation4], 16  }
 0x1d8   :  { %272 = vsyncadd [#allocation4], 4294967280 }
 0x1d9   :  { %175 = vsyncpa [#allocation3], 1 }
 0x1da   :  { %176 = vsyncpa [#allocation4], 1 }
 0x1db   :  { %177 = vsyncpa [#allocation5], 1 }

</bundles_post_ra>
